<compile_context>
chip_gen: v5e
topology: v5e:2x2
jax: 0.10.0
libtpu: 0.0.40
codegen_flags: <defaults>
</compile_context>

<pallas_src>
import jax
import jax.numpy as jnp
from jax.experimental import pallas as pl
from jax.experimental.pallas import tpu as pltpu

LANE = 128  # TPU lane width.


def _round_up(x, m):
    return (x + m - 1) // m * m


def _tpu_config():
    """Per-generation MXU tile width and VMEM budget (conservative fallbacks)."""
    kind = ""
    try:
        kind = jax.devices()[0].device_kind.lower()
    except Exception:
        pass
    if "v7" in kind or "7x" in kind:          # 64 MiB VMEM, 256-wide MXU
        cfg = dict(mxu_width=256, vmem_limit=48 * 1024 * 1024)
    elif "v6" in kind or "trillium" in kind:  # 128 MiB VMEM, 256-wide MXU
        cfg = dict(mxu_width=256, vmem_limit=96 * 1024 * 1024)
    elif "v5" in kind:                        # 128 MiB VMEM, 128-wide MXU
        cfg = dict(mxu_width=128, vmem_limit=96 * 1024 * 1024)
    else:                                     # unknown generation: play safe
        cfg = dict(mxu_width=128, vmem_limit=32 * 1024 * 1024)
    try:  # clamp against the actual part if the query is available
        cap = int(pltpu.get_tpu_info().vmem_capacity_bytes)
        cfg["vmem_limit"] = min(cfg["vmem_limit"], int(cap * 0.75))
    except Exception:
        pass
    return cfg


# ---------------------------------------------------------------------------
# Kernels
# ---------------------------------------------------------------------------

def _matmul_bias_relu_kernel(p_ref, w_ref, b_ref, o_ref):
    """im2col path: one fused matmul + bias + ReLU per grid step.

    p_ref: (TM, K)    im2col patches tile
    w_ref: (K, TCOUT) weight tile (VMEM-resident across batch / pixel tiles)
    b_ref: (1, TCOUT) bias tile (f32)
    o_ref: (TM, TCOUT)
    """
    acc = jnp.dot(p_ref[...], w_ref[...], preferred_element_type=jnp.float32)
    out = acc + b_ref[...].astype(jnp.float32)
    o_ref[...] = jnp.maximum(out, 0.0).astype(o_ref.dtype)


def _window_accumulate(x, w_ref):
    """Kh*Kw shifted-window MXU matmuls, f32 accumulation.

    x:     (Hp, Wp, Cin) value
    w_ref: (Kh, Kw, Cin, TCOUT) ref
    returns (Ho*Wo, TCOUT) f32
    """
    hp, wp, cin = x.shape
    kh, kw, _, tcout = w_ref.shape
    ho = hp - kh + 1
    wo = wp - kw + 1
    acc = jnp.zeros((ho * wo, tcout), jnp.float32)
    for dw in range(kw):
        # One W-window slice + one (H,W)->pixels merge per kw tap; the kh shift
        # below is just a row offset into the merged slab (cheap).
        xf = x[:, dw:dw + wo, :].reshape(hp * wo, cin)
        for dh in range(kh):
            patch = xf[dh * wo:dh * wo + ho * wo, :]
            acc = acc + jnp.dot(patch, w_ref[dh, dw],
                                preferred_element_type=jnp.float32)
    return acc


def _conv_relu_direct_kernel(x_ref, w_ref, b_ref, o_ref):
    """Direct path, whole Cin in one step (no scratch round trip)."""
    acc = _window_accumulate(x_ref[...], w_ref)
    out = acc + b_ref[...].astype(jnp.float32)
    o_ref[...] = jnp.maximum(out, 0.0).astype(o_ref.dtype)


def _conv_relu_direct_carry_kernel(x_ref, w_ref, b_ref, o_ref, acc_ref):
    """Direct path with Cin tiling: f32 VMEM accumulator across grid axis 2."""
    ci = pl.program_id(2)

    @pl.when(ci == 0)
    def _init():
        acc_ref[...] = jnp.zeros_like(acc_ref)

    acc_ref[...] += _window_accumulate(x_ref[...], w_ref)

    @pl.when(ci == pl.num_programs(2) - 1)
    def _finalize():
        out = acc_ref[...] + b_ref[...].astype(jnp.float32)
        o_ref[...] = jnp.maximum(out, 0.0).astype(o_ref.dtype)


# ---------------------------------------------------------------------------
# Wrappers
# ---------------------------------------------------------------------------

def _conv_as_matmul(xp, wq, bpad, n, ho, wo, cin, kh, kw, cout_p, tcout,
                    out_dtype, cfg):
    """im2col in the wrapper -> fused matmul+bias+ReLU Pallas kernel."""
    cout = wq.shape[-1]
    if kh == 1 and kw == 1:
        patches = xp.reshape(n, ho * wo, cin)
    else:
        cols = []
        for dh in range(kh):
            for dw in range(kw):
                cols.append(xp[:, dh:dh + ho, dw:dw + wo, :])
        patches = jnp.concatenate(cols, axis=-1).reshape(n, ho * wo, kh * kw * cin)
    k_dim = kh * kw * cin

    wmat = wq.reshape(kh * kw * cin, cout)
    if cout_p != cout:
        wmat = jnp.pad(wmat, ((0, 0), (0, cout_p - cout)))

    m = ho * wo
    tm_cap = 512
    tm = _round_up(m, 8) if m <= tm_cap else tm_cap
    m_p = _round_up(m, tm)
    if m_p != m:
        patches = jnp.pad(patches, ((0, 0), (0, m_p - m), (0, 0)))

    grid = (cout_p // tcout, n, m_p // tm)

    out_flat = pl.pallas_call(
        _matmul_bias_relu_kernel,
        out_shape=jax.ShapeDtypeStruct((n, m_p, cout_p), out_dtype),
        grid_spec=pltpu.PrefetchScalarGridSpec(
            num_scalar_prefetch=0,
            grid=grid,
            in_specs=[
                pl.BlockSpec((None, tm, k_dim), lambda co, b, mi: (b, mi, 0)),
                # Weight index is constant across (batch, pixel-tile) -> each
                # Cout tile of the weight is DMA'd once and stays VMEM-resident.
                pl.BlockSpec((k_dim, tcout), lambda co, b, mi: (0, co)),
                pl.BlockSpec((1, tcout), lambda co, b, mi: (0, co)),
            ],
            out_specs=pl.BlockSpec((None, tm, tcout),
                                   lambda co, b, mi: (b, mi, co)),
        ),
        compiler_params=pltpu.CompilerParams(
            dimension_semantics=("parallel", "parallel", "parallel"),
            vmem_limit_bytes=cfg["vmem_limit"],
        ),
    )(patches, wmat, bpad)
    return out_flat


def _conv_direct(xp, wq, bpad, n, ho, wo, cin, kh, kw, cout_p, tcout,
                 out_dtype, cfg, max_cin_tile):
    """Direct shifted-window conv for Cin >= 128."""
    _, hp, wps, _ = xp.shape
    cout = wq.shape[-1]
    in_bytes = jnp.dtype(xp.dtype).itemsize
    out_bytes = jnp.dtype(out_dtype).itemsize
    vmem_limit = cfg["vmem_limit"]

    def _fits(tcin):
        est = 2 * (hp * wps * tcin * in_bytes              # input block (x2 buf)
                   + kh * kw * tcin * tcout * in_bytes     # weight tile
                   + ho * wo * tcout * out_bytes)          # output block
        est += 2 * ho * wo * tcout * 4                     # f32 accumulator(s)
        return est <= 0.6 * vmem_limit

    if max_cin_tile is None and _fits(cin):
        # Collapse the Cin axis: no scratch, no input re-streaming per Cin tile.
        cin_p, tcin = cin, cin
    else:
        tcin = max_cin_tile if max_cin_tile is not None else (
            256 if cfg["mxu_width"] >= 256 else 128)
        cin_p = _round_up(cin, tcin)
        # TODO(synk): if even one Cin tile with the whole image doesn't fit
        # (stem-size maps on v7x), add a spatial grid axis with halo'd windows.

    if cin_p != cin:
        xp = jnp.pad(xp, ((0, 0), (0, 0), (0, 0), (0, cin_p - cin)))
    wpad = wq
    if cin_p != cin or cout_p != cout:
        wpad = jnp.pad(wq, ((0, 0), (0, 0), (0, cin_p - cin), (0, cout_p - cout)))

    cin_steps = cin_p // tcin
    cout_tiles = cout_p // tcout

    if cin_steps == 1:
        grid = (cout_tiles, n)
        in_specs = [
            pl.BlockSpec((None, hp, wps, tcin), lambda co, b: (b, 0, 0, 0)),
            # Constant across the batch axis -> weight tile stays VMEM-resident.
            pl.BlockSpec((kh, kw, tcin, tcout), lambda co, b: (0, 0, 0, co)),
            pl.BlockSpec((1, tcout), lambda co, b: (0, co)),
        ]
        out_spec = pl.BlockSpec((None, ho * wo, tcout), lambda co, b: (b, 0, co))
        kernel = _conv_relu_direct_kernel
        scratch = []
        dims = ("parallel", "parallel")
    else:
        grid = (cout_tiles, n, cin_steps)
        in_specs = [
            pl.BlockSpec((None, hp, wps, tcin), lambda co, b, ci: (b, 0, 0, ci)),
            pl.BlockSpec((kh, kw, tcin, tcout), lambda co, b, ci: (0, 0, ci, co)),
            pl.BlockSpec((1, tcout), lambda co, b, ci: (0, co)),
        ]
        out_spec = pl.BlockSpec((None, ho * wo, tcout),
                                lambda co, b, ci: (b, 0, co))
        kernel = _conv_relu_direct_carry_kernel
        scratch = [pltpu.VMEM((ho * wo, tcout), jnp.float32)]
        dims = ("parallel", "parallel", "arbitrary")

    return pl.pallas_call(
        kernel,
        out_shape=jax.ShapeDtypeStruct((n, ho * wo, cout_p), out_dtype),
        grid_spec=pltpu.PrefetchScalarGridSpec(
            num_scalar_prefetch=0,
            grid=grid,
            in_specs=in_specs,
            out_specs=out_spec,
            scratch_shapes=scratch,
        ),
        compiler_params=pltpu.CompilerParams(
            dimension_semantics=dims,
            vmem_limit_bytes=vmem_limit,
        ),
    )(xp, wpad, bpad)


def basic_conv2d_nhwc(x_nhwc, w_hwio, bias, padding=0,
                      compute_dtype=jnp.bfloat16, max_cin_tile=None):
    """relu(conv2d(x) + b), stride 1, NHWC activations, (KH,KW,Cin,Cout) weights."""
    n, h, w_sp, cin = x_nhwc.shape
    kh, kw, _, cout = w_hwio.shape
    ho = h + 2 * padding - kh + 1
    wo = w_sp + 2 * padding - kw + 1
    out_dtype = x_nhwc.dtype

    cfg = _tpu_config()
    lane = 256 if (cfg["mxu_width"] >= 256 and cout > 128) else 128
    cout_p = _round_up(cout, lane)
    tcout = lane

    cdtype = compute_dtype if compute_dtype is not None else x_nhwc.dtype
    xp = x_nhwc
    if padding:
        xp = jnp.pad(xp, ((0, 0), (padding, padding), (padding, padding), (0, 0)))
    xp = xp.astype(cdtype)
    wq = w_hwio.astype(cdtype)
    bpad = jnp.pad(bias.astype(jnp.float32), (0, cout_p - cout)).reshape(1, cout_p)

    # 1x1 convs and small-Cin (stem-like) layers take the dense-K matmul path;
    # wide-Cin layers keep the direct sliding-window path (no KhKw HBM blow-up).
    use_matmul = (kh * kw == 1) or (cin < LANE)
    if use_matmul:
        out_flat = _conv_as_matmul(xp, wq, bpad, n, ho, wo, cin, kh, kw,
                                   cout_p, tcout, out_dtype, cfg)
        out = out_flat[:, :ho * wo, :cout].reshape(n, ho, wo, cout)
    else:
        out_flat = _conv_direct(xp, wq, bpad, n, ho, wo, cin, kh, kw,
                                cout_p, tcout, out_dtype, cfg, max_cin_tile)
        out = out_flat[:, :, :cout].reshape(n, ho, wo, cout)
    return out


def basic_conv2d(x_nchw, weight_oihw, bias, padding=0,
                 compute_dtype=jnp.bfloat16, max_cin_tile=None):
    """PyTorch-facing BasicConv2d.forward: relu(conv2d(x, W, b, padding)).

    NCHW<->NHWC transposes exist only to match nn.Conv2d's API; use
    basic_conv2d_nhwc end-to-end in a full model to avoid them.
    """
    x_nhwc = jnp.transpose(x_nchw, (0, 2, 3, 1))
    w_hwio = jnp.transpose(weight_oihw, (2, 3, 1, 0))
    out_nhwc = basic_conv2d_nhwc(x_nhwc, w_hwio, bias, padding=padding,
                                 compute_dtype=compute_dtype,
                                 max_cin_tile=max_cin_tile)
    return jnp.transpose(out_nhwc, (0, 3, 1, 2))


if __name__ == "__main__":
    key = jax.random.PRNGKey(0)
    k1, k2 = jax.random.split(key)

    def make_inputs(k, n, cin, h, w, cout, ksize):
        kx, kw_, kb = jax.random.split(k, 3)
        x = jax.random.normal(kx, (n, cin, h, w), dtype=jnp.float32)
        bound = 1.0 / float(cin * ksize * ksize) ** 0.5
        weight = jax.random.uniform(kw_, (cout, cin, ksize, ksize),
                                    jnp.float32, -bound, bound)
        b = jax.random.uniform(kb, (cout,), jnp.float32, -bound, bound)
        return x, weight, b

    def reference(x, weight, b, pad, round_to=None):
        xr, wr = x, weight
        if round_to is not None:  # match the kernel's bf16-rounded inputs
            xr = xr.astype(round_to).astype(jnp.float32)
            wr = wr.astype(round_to).astype(jnp.float32)
        out = jax.lax.conv_general_dilated(
            xr, wr, window_strides=(1, 1),
            padding=[(pad, pad), (pad, pad)],
            dimension_numbers=("NCHW", "OIHW", "NCHW"),
            precision=jax.lax.Precision.HIGHEST)
        return jnp.maximum(out + b[None, :, None, None], 0.0)

    # --- Case 1: the spec's small config (im2col / matmul path). ---
    N, Cin, H, W, Cout, K, pad = 2, 4, 16, 16, 8, 3, 1
    x, weight, bias = make_inputs(k1, N, Cin, H, W, Cout, K)
    out = basic_conv2d(x, weight, bias, padding=pad)
    jax.block_until_ready(out)
    assert out.shape == (N, Cout, H, W)
    ref_bf16 = reference(x, weight, bias, pad, round_to=jnp.bfloat16)
    ref_f32 = reference(x, weight, bias, pad)
    assert jnp.allclose(out, ref_bf16, atol=2e-3, rtol=2e-3), float(
        jnp.max(jnp.abs(out - ref_bf16)))
    assert jnp.allclose(out, ref_f32, atol=6e-2, rtol=6e-2), float(
        jnp.max(jnp.abs(out - ref_f32)))

    # --- Case 2: Cin >= 128 exercises the direct sliding-window path. ---
    N2, Cin2, H2, W2, Cout2, K2, pad2 = 2, 160, 8, 8, 32, 3, 1
    x2, weight2, bias2 = make_inputs(k2, N2, Cin2, H2, W2, Cout2, K2)
    out2 = basic_conv2d(x2, weight2, bias2, padding=pad2)
    ref2 = reference(x2, weight2, bias2, pad2, round_to=jnp.bfloat16)
    assert out2.shape == (N2, Cout2, H2, W2)
    assert jnp.allclose(out2, ref2, atol=2e-3, rtol=2e-3), float(
        jnp.max(jnp.abs(out2 - ref2)))

    # --- Case 3: forced Cin tiling exercises the carry (reduction) kernel. ---
    out3 = basic_conv2d(x2, weight2, bias2, padding=pad2, max_cin_tile=128)
    assert jnp.allclose(out3, ref2, atol=2e-3, rtol=2e-3), float(
        jnp.max(jnp.abs(out3 - ref2)))

    jax.block_until_ready((out, out2, out3))
    print("KERNEL_OK")
</pallas_src>

<mosaic_0001>
module attributes {stable_mosaic.version = 11 : i64} {
  func.func @_matmul_bias_relu_kernel(%arg0: i32, %arg1: i32, %arg2: i32, %arg3: memref<1x256x36xbf16, #tpu.memory_space<vmem>>, %arg4: memref<36x128xbf16, #tpu.memory_space<vmem>>, %arg5: memref<1x128xf32, #tpu.memory_space<vmem>>, %arg6: memref<1x256x128xf32, #tpu.memory_space<vmem>>) attributes {dimension_semantics = [#tpu.dimension_semantics<parallel>, #tpu.dimension_semantics<parallel>, #tpu.dimension_semantics<parallel>], iteration_bounds = array<i64: 1, 2, 1>, scalar_prefetch = 0 : i64, scratch_operands = 0 : i64, tpu.core_type = #tpu.core_type<tc>, window_params = [{transform_indices = @transform_0, window_bounds = array<i64: 1, 256, 36>}, {transform_indices = @transform_1, window_bounds = array<i64: 36, 128>}, {transform_indices = @transform_2, window_bounds = array<i64: 1, 128>}, {transform_indices = @transform_3, window_bounds = array<i64: 1, 256, 128>}]} {
    %c0 = arith.constant 0 : index
    %c0_0 = arith.constant 0 : index
    %c0_1 = arith.constant 0 : index
    %0 = vector.load %arg3[%c0, %c0_0, %c0_1] : memref<1x256x36xbf16, #tpu.memory_space<vmem>>, vector<1x256x36xbf16>
    %1 = vector.shape_cast %0 : vector<1x256x36xbf16> to vector<256x36xbf16>
    %c0_2 = arith.constant 0 : index
    %c0_3 = arith.constant 0 : index
    %2 = vector.load %arg4[%c0_2, %c0_3] : memref<36x128xbf16, #tpu.memory_space<vmem>>, vector<36x128xbf16>
    %cst = arith.constant dense<0.000000e+00> : vector<256x128xf32>
    %3 = tpu.matmul %1, %2, %cst {dimension_numbers = #tpu.dot_dimension_numbers<[1], [0], [0], [1], [0, 0, 1, 1], [], []>} : vector<256x36xbf16>, vector<36x128xbf16>, vector<256x128xf32> -> vector<256x128xf32>
    %c0_4 = arith.constant 0 : index
    %c0_5 = arith.constant 0 : index
    %4 = vector.load %arg5[%c0_4, %c0_5] : memref<1x128xf32, #tpu.memory_space<vmem>>, vector<1x128xf32>
    %5 = vector.broadcast %4 : vector<1x128xf32> to vector<256x128xf32>
    %6 = arith.addf %3, %5 : vector<256x128xf32>
    %cst_6 = arith.constant 0.000000e+00 : f32
    %7 = vector.broadcast %cst_6 : f32 to vector<256x128xf32>
    %8 = arith.maximumf %6, %7 : vector<256x128xf32>
    %c0_7 = arith.constant 0 : index
    %c0_8 = arith.constant 0 : index
    %c0_9 = arith.constant 0 : index
    %9 = vector.load %arg6[%c0_7, %c0_8, %c0_9] : memref<1x256x128xf32, #tpu.memory_space<vmem>>, vector<1x256x128xf32>
    %10 = vector.shape_cast %9 : vector<1x256x128xf32> to vector<256x128xf32>
    %11 = vector.shape_cast %8 : vector<256x128xf32> to vector<1x256x128xf32>
    tpu.vector_store %arg6[%c0_7, %c0_8, %c0_9], %11 {strides = array<i32>} : memref<1x256x128xf32, #tpu.memory_space<vmem>>, vector<1x256x128xf32>,
    return
  }
  func.func @transform_0(%arg0: i32, %arg1: i32, %arg2: i32) -> (i32, i32, i32) {
    %c0_i32 = arith.constant 0 : i32
    %c0_i32_0 = arith.constant 0 : i32
    return %arg1, %arg2, %c0_i32 : i32, i32, i32
  }
  func.func @transform_1(%arg0: i32, %arg1: i32, %arg2: i32) -> (i32, i32) {
    %c0_i32 = arith.constant 0 : i32
    %c0_i32_0 = arith.constant 0 : i32
    return %c0_i32, %arg0 : i32, i32
  }
  func.func @transform_2(%arg0: i32, %arg1: i32, %arg2: i32) -> (i32, i32) {
    %c0_i32 = arith.constant 0 : i32
    %c0_i32_0 = arith.constant 0 : i32
    return %c0_i32, %arg0 : i32, i32
  }
  func.func @transform_3(%arg0: i32, %arg1: i32, %arg2: i32) -> (i32, i32, i32) {
    %c0_i32 = arith.constant 0 : i32
    return %arg1, %arg2, %arg0 : i32, i32, i32
  }
}

</mosaic_0001>

<bundles_post_ra>
// kernel: tpu_custom_call.1
= control target key start
LH: loop header
LB: loop body
LE: loop exit
PB: predicated region body
PF: predicated region fallthrough
CT: control target
= control target key end

     0   :  { %8 = vsyncpa [#allocation3], 0  ;;  %s1220_s0 = inlined_call_operand.vmem [shape: bf16[2,256,36], index: 0, kind: input, shape index: {}]   ;;  %s1221_s1 = inlined_call_operand.vmem [shape: bf16[36,128], index: 1, kind: input, shape index: {}]   ;;  %s1222_s2 = inlined_call_operand.vmem [shape: f32[1,128], index: 2, kind: input, shape index: {}]   ;;  %s1223_s3 = inlined_call_operand.hbm [shape: f32[2,256,128], index: 3, kind: output, shape index: {}]  }
   0x1   :  { %10 = vsyncpa [#allocation3 + $0x1], 0  ;;  %s1004_s12 = smov 0   ;;  %s1006_s13 = smov 0  }
   0x2   :  { %s1008_s14 = smov 0   ;;  %s1010_s15 = smov 0  }
   0x3   :  { %s1012_s16 = smov 0   ;;  %s1014_s17 = smov 0  }
   0x4 LB: > { %s712_s18 = sadd.s32 4294967295, %s980_s17   ;;  %s713_s19 = sadd.s32 4294967294, %s980_s17   ;;  %s980_s17 = sphi %s1014_s17, %s16_s17   ;;  %s976_s16 = sphi %s1012_s16, %s1230_s16   ;;  %s972_s15 = sphi %s1010_s15, %s1229_s15   ;;  %s968_s14 = sphi %s1008_s14, %s1228_s14   ;;  %s964_s13 = sphi %s1006_s13, %s1227_s13   ;;  %s960_s12 = sphi %s1004_s12, %s1226_s12  }
   0x5   : > { %s31_s20 = sadd.s32 1, %s976_s16  ;;  %s126_s21 = sadd.s32 1, %s968_s14 }
   0x6   : > { %p33_p0 = scmp.ge.s32.totalorder %s31_s20, 2  ;;  %p136_p1 = scmp.ne.s32.totalorder %s968_s14, %s964_s13 }
   0x7   : > { %p137_p2 = scmp.eq.s32.totalorder %s712_s18, 1  ;;  %p142_p3 = scmp.ne.s32.totalorder %s964_s13, %s960_s12 }
   0x8   : > { %s1232_s20 = smov (%p33_p0, %s31_s20), 0  ;;  %p143_p5 = scmp.eq.s32.totalorder %s713_s19, 1 }
   0x9   : > { %p1044_p4 = por %p137_p2, %p136_p1  ;;  %s119_s23 = ssub.s32 %s976_s16, %s1232_s20 }
   0xa   : > { %p718_p6 = scmp.ge.s32.totalorder %s980_s17, 1  ;;  %p124_p7 = scmp.eq.s32.totalorder %s119_s23, 0 }
   0xb   : > { %p1051_p8 = por %p143_p5, %p142_p3  ;;  %p187_p9 = scmp.lt.s32.totalorder %s980_s17, 3 }
   0xc   : > { %s1057_s25 = scalar_select %p124_p7, %s968_s14, %s126_s21  }
   0xd   : > { %p188_p10 = pnand %p718_p6, %p187_p9 }
   0xe   : > { %p223_p11 = scmp.lt.s32.totalorder (!%p188_p10), %s972_s15, 1  ;;  %s219_s10 = sand.u32 (!%p188_p10), 1, %s964_s13  }
   0xf   : > { %191 = sbr.rel (%p188_p10) target bundleno = 235 (0xeb), region = 32  ;;  %s719_s19 = sshll.u32 (!%p188_p10), %s219_s10, 8 }
  0x10   : > { %s1117_s21 = scalar_lea.vmem (!%p188_p10), [#allocation2], %s719_s19  ;;  %s834_s23 = sshll.u32 (!%p188_p10), %s972_s15, 8 }
  0x11   : > { %s599_s29 = sshll.u32 (!%p188_p10), %s1117_s21, 4  ;;  %s584_s30 = scalar_lea.sflag (!%p188_p10), [#allocation3], %s219_s10  ;;  %s600_s29 = int_to_ptr.vmem [resolvable:$true] %s599_s29 }
  0x12   : > { %s922_s8 = scalar_lea.hbm (!%p188_p10), %s1223_s3, 512 }
  0x14   : > { %v277_v0 = vld [vmem:[%s1221_s1 + $0x10] sm:$0x3]  ;;  %vm426_vm0 = vcmask 1041408   ;;  %s224_s28 = scalar_select %p223_p11, %s972_s15, 1  ;;  %v833_v4 = vld [vmem:[%s1221_s1 + $0x8] sm:$0xff]  ;;  %v832_v5 = vld [vmem:[%s1221_s1] sm:$0xff] }
  0x15   : > { %v371_v1 = vunpack.c.l.b16 %v277_v0  ;;  %vm377_vm1 = vcmask 293888   ;;  %v1111_v22 = vld [vmem:[%s1222_s2] ss:$0 sm:$0xff] }
  0x16   : > { %s815_s4 = sshll.u32 %s224_s28, 7  ;;  %s598_s28 = scalar_lea.hbm %s1223_s3, %s834_s23 }
  0x17   : > { %v374_v2 = vpack.c.b16 %v371_v1, %v371_v1  ;;  %s1073_s9 = scalar_lea.vmem %s1220_s0, %s815_s4  ;;  %s601_s15 = sshll.u32 %s598_s28, 4  ;;  %s602_s15 = int_to_ptr.hbm [resolvable:$true] %s601_s15 }
  0x18   : > { %v816_v6 = vld [vmem:[%s1073_s9] sm:$0xff]  ;;  %v817_v10 = vld [vmem:[%s1073_s9 + $0x8] sm:$0xff]  ;;  %v818_v14 = vld [vmem:[%s1073_s9 + $0x10] sm:$0xff]  ;;  %s916_s4 = sshra.s32 %s602_s15, 4  ;;  %s917_s4 = int_to_ptr.hbm [resolvable:$true] %s916_s4 }
  0x19   : > { %v428_v3 = vsel %vm426_vm0, %v374_v2, 0  ;;  %v820_v7 = vld [vmem:[%s1073_s9 + $0x20] sm:$0xff]  ;;  %v821_v11 = vld [vmem:[%s1073_s9 + $0x28] sm:$0xff]  ;;  %v822_v15 = vld [vmem:[%s1073_s9 + $0x30] sm:$0xff]  ;;  %s918_s5 = scalar_lea.hbm %s917_s4, 256  ;;  %p923_p1 = scmp.lt.s32.totalorder %s917_s4, %s1223_s3 }
  0x1a   : > { %435 = vmatpush.bf16.msra.mxu0 %v428_v3  ;;  %835 = vmatpush.bf16.msra.mxu1 %v428_v3  ;;  %v824_v8 = vld [vmem:[%s1073_s9 + $0x40] sm:$0xff]  ;;  %v825_v12 = vld [vmem:[%s1073_s9 + $0x48] sm:$0xff]  ;;  %v826_v16 = vld [vmem:[%s1073_s9 + $0x50] sm:$0xff]  ;;  %p919_p12 = scmp.ne.s32.totalorder %s917_s4, %s918_s5  ;;  %p924_p2 = scmp.lt.s32.totalorder %s922_s8, %s918_s5 }
  0x1b   : > { %836 = vmatpush.bf16.msra.mxu2 %v428_v3  ;;  %837 = vmatpush.bf16.msra.mxu3 %v428_v3  ;;  %v828_v9 = vld [vmem:[%s1073_s9 + $0x60] sm:$0xff]  ;;  %v829_v13 = vld [vmem:[%s1073_s9 + $0x68] sm:$0xff]  ;;  %v830_v17 = vld [vmem:[%s1073_s9 + $0x70] sm:$0xff] }
  0x1c   : > { %v819_v18 = vld [vmem:[%s1073_s9 + $0x18] sm:$0xff]  ;;  %p920_p13 = pnand %p919_p12, %p1044_p4  ;;  %p925_p3 = por %p924_p2, %p923_p1 }
  0x1d   : > { %v823_v19 = vld [vmem:[%s1073_s9 + $0x38] sm:$0xff] }
  0x1e   : > { %436 = vmatpush.bf16.msra.mxu0 %v833_v4  ;;  %838 = vmatpush.bf16.msra.mxu1 %v833_v4  ;;  %v827_v20 = vld [vmem:[%s1073_s9 + $0x58] sm:$0xff]  ;;  %p921_p0 = pneg %p920_p13 }
  0x1f   : > { %839 = vmatpush.bf16.msra.mxu2 %v833_v4  ;;  %840 = vmatpush.bf16.msra.mxu3 %v833_v4  ;;  %v831_v21 = vld [vmem:[%s1073_s9 + $0x78] sm:$0xff] }
  0x20   : > { %p926_p5 = pnand %p925_p3, %p921_p0 }
  0x22   : > { %437 = vmatpush.bf16.msra.mxu0 %v832_v5  ;;  %841 = vmatpush.bf16.msra.mxu1 %v832_v5 }
  0x23   : > { %842 = vmatpush.bf16.msra.mxu2 %v832_v5  ;;  %843 = vmatpush.bf16.msra.mxu3 %v832_v5 }
  0x25   : > { %794 = vmatmul.msk.bf16.vlgmr.msra.gmra.mxu0 %vm377_vm1, %v816_v6  ;;  %798 = vmatmul.msk.bf16.vlgmr.msra.gmra.mxu1 %vm377_vm1, %v820_v7 }
  0x26   : > { %802 = vmatmul.msk.bf16.vlgmr.msra.gmra.mxu2 %vm377_vm1, %v824_v8  ;;  %806 = vmatmul.msk.bf16.vlgmr.msra.gmra.mxu3 %vm377_vm1, %v828_v9 }
  0x35   : > { %795 = vmatmul.msk.bf16.gmra.mxu0 %vm377_vm1, %v817_v10  ;;  %799 = vmatmul.msk.bf16.gmra.mxu1 %vm377_vm1, %v821_v11 }
  0x36   : > { %803 = vmatmul.msk.bf16.gmra.mxu2 %vm377_vm1, %v825_v12  ;;  %807 = vmatmul.msk.bf16.gmra.mxu3 %vm377_vm1, %v829_v13 }
  0x45   : > { %796 = vmatmul.msk.bf16.gmra.mxu0 %vm377_vm1, %v818_v14  ;;  %800 = vmatmul.msk.bf16.gmra.mxu1 %vm377_vm1, %v822_v15 }
  0x46   : > { %804 = vmatmul.msk.bf16.gmra.mxu2 %vm377_vm1, %v826_v16  ;;  %808 = vmatmul.msk.bf16.gmra.mxu3 %vm377_vm1, %v830_v17 }
  0x55   : > { %797 = vmatmul.msk.bf16.gmra.mxu0 %vm377_vm1, %v819_v18  ;;  %801 = vmatmul.msk.bf16.gmra.mxu1 %vm377_vm1, %v823_v19 }
  0x56   : > { %805 = vmatmul.msk.bf16.gmra.mxu2 %vm377_vm1, %v827_v20  ;;  %809 = vmatmul.msk.bf16.gmra.mxu3 %vm377_vm1, %v831_v21 }
  0xa2   : > { %v439_v23 = vpop.f32.mrf.mxu0  ;;  %v459_v24 = vpop.f32.mrf.mxu1 }
  0xa3   : > { %v440_v25 = vadd.f32 %v1111_v22, %v439_v23  ;;  %v460_v26 = vadd.f32 %v1111_v22, %v459_v24 }
  0xa5   : > { %v519_v27 = vmax.f32 %v440_v25, 0.0  ;;  %v527_v28 = vmax.f32 %v460_v26, 0.0 }
  0xa7   : > { %551 = vst [vmem:[%s1117_s21] sm:$0xff] %v519_v27 }
  0xa8   : > { %559 = vst [vmem:[%s1117_s21 + $0x40] sm:$0xff] %v527_v28 }
  0xa9   : > { %v479_v29 = vpop.f32.mrf.mxu2  ;;  %v499_v30 = vpop.f32.mrf.mxu3 }
  0xaa   : > { %v480_v31 = vadd.f32 %v1111_v22, %v479_v29  ;;  %v500_v32 = vadd.f32 %v1111_v22, %v499_v30  ;;  %v441_v33 = vpop.f32.mrf.mxu0  ;;  %v461_v34 = vpop.f32.mrf.mxu1 }
  0xab   : > { %v442_v35 = vadd.f32 %v1111_v22, %v441_v33  ;;  %v462_v36 = vadd.f32 %v1111_v22, %v461_v34 }
  0xac   : > { %v535_v37 = vmax.f32 %v480_v31, 0.0  ;;  %v543_v38 = vmax.f32 %v500_v32, 0.0 }
  0xad   : > { %v520_v39 = vmax.f32 %v442_v35, 0.0  ;;  %v528_v40 = vmax.f32 %v462_v36, 0.0 }
  0xae   : > { %567 = vst [vmem:[%s1117_s21 + $0x80] sm:$0xff] %v535_v37 }
  0xaf   : > { %575 = vst [vmem:[%s1117_s21 + $0xc0] sm:$0xff] %v543_v38 }
  0xb0   : > { %552 = vst [vmem:[%s1117_s21 + $0x8] sm:$0xff] %v520_v39 }
  0xb1   : > { %560 = vst [vmem:[%s1117_s21 + $0x48] sm:$0xff] %v528_v40  ;;  %v481_v41 = vpop.f32.mrf.mxu2  ;;  %v501_v42 = vpop.f32.mrf.mxu3 }
  0xb2   : > { %v482_v43 = vadd.f32 %v1111_v22, %v481_v41  ;;  %v502_v44 = vadd.f32 %v1111_v22, %v501_v42  ;;  %v444_v45 = vpop.f32.mrf.mxu0  ;;  %v464_v46 = vpop.f32.mrf.mxu1 }
  0xb3   : > { %v445_v47 = vadd.f32 %v1111_v22, %v444_v45  ;;  %v465_v48 = vadd.f32 %v1111_v22, %v464_v46 }
  0xb4   : > { %v536_v49 = vmax.f32 %v482_v43, 0.0  ;;  %v544_v50 = vmax.f32 %v502_v44, 0.0 }
  0xb5   : > { %v521_v51 = vmax.f32 %v445_v47, 0.0  ;;  %v529_v52 = vmax.f32 %v465_v48, 0.0 }
  0xb6   : > { %568 = vst [vmem:[%s1117_s21 + $0x88] sm:$0xff] %v536_v49 }
  0xb7   : > { %576 = vst [vmem:[%s1117_s21 + $0xc8] sm:$0xff] %v544_v50 }
  0xb8   : > { %553 = vst [vmem:[%s1117_s21 + $0x10] sm:$0xff] %v521_v51 }
  0xb9   : > { %561 = vst [vmem:[%s1117_s21 + $0x50] sm:$0xff] %v529_v52  ;;  %v484_v53 = vpop.f32.mrf.mxu2  ;;  %v504_v54 = vpop.f32.mrf.mxu3 }
  0xba   : > { %v485_v55 = vadd.f32 %v1111_v22, %v484_v53  ;;  %v505_v56 = vadd.f32 %v1111_v22, %v504_v54  ;;  %v446_v57 = vpop.f32.mrf.mxu0  ;;  %v466_v58 = vpop.f32.mrf.mxu1 }
  0xbb   : > { %v447_v59 = vadd.f32 %v1111_v22, %v446_v57  ;;  %v467_v60 = vadd.f32 %v1111_v22, %v466_v58 }
  0xbc   : > { %v537_v61 = vmax.f32 %v485_v55, 0.0  ;;  %v545_v62 = vmax.f32 %v505_v56, 0.0 }
  0xbd   : > { %v522_v63 = vmax.f32 %v447_v59, 0.0  ;;  %v530_v0 = vmax.f32 %v467_v60, 0.0 }
  0xbe   : > { %569 = vst [vmem:[%s1117_s21 + $0x90] sm:$0xff] %v537_v61 }
  0xbf   : > { %577 = vst [vmem:[%s1117_s21 + $0xd0] sm:$0xff] %v545_v62 }
  0xc0   : > { %554 = vst [vmem:[%s1117_s21 + $0x18] sm:$0xff] %v522_v63 }
  0xc1   : > { %562 = vst [vmem:[%s1117_s21 + $0x58] sm:$0xff] %v530_v0  ;;  %v486_v1 = vpop.f32.mrf.mxu2  ;;  %v506_v2 = vpop.f32.mrf.mxu3 }
  0xc2   : > { %v487_v3 = vadd.f32 %v1111_v22, %v486_v1  ;;  %v507_v4 = vadd.f32 %v1111_v22, %v506_v2  ;;  %v449_v5 = vpop.f32.mrf.mxu0  ;;  %v469_v6 = vpop.f32.mrf.mxu1 }
  0xc3   : > { %v450_v7 = vadd.f32 %v1111_v22, %v449_v5  ;;  %v470_v8 = vadd.f32 %v1111_v22, %v469_v6 }
  0xc4   : > { %v538_v9 = vmax.f32 %v487_v3, 0.0  ;;  %v546_v10 = vmax.f32 %v507_v4, 0.0 }
  0xc5   : > { %v523_v11 = vmax.f32 %v450_v7, 0.0  ;;  %v531_v12 = vmax.f32 %v470_v8, 0.0 }
  0xc6   : > { %570 = vst [vmem:[%s1117_s21 + $0x98] sm:$0xff] %v538_v9 }
  0xc7   : > { %578 = vst [vmem:[%s1117_s21 + $0xd8] sm:$0xff] %v546_v10 }
  0xc8   : > { %555 = vst [vmem:[%s1117_s21 + $0x20] sm:$0xff] %v523_v11 }
  0xc9   : > { %563 = vst [vmem:[%s1117_s21 + $0x60] sm:$0xff] %v531_v12  ;;  %v489_v13 = vpop.f32.mrf.mxu2  ;;  %v509_v14 = vpop.f32.mrf.mxu3 }
  0xca   : > { %v490_v15 = vadd.f32 %v1111_v22, %v489_v13  ;;  %v510_v16 = vadd.f32 %v1111_v22, %v509_v14  ;;  %v451_v17 = vpop.f32.mrf.mxu0  ;;  %v471_v18 = vpop.f32.mrf.mxu1 }
  0xcb   : > { %v452_v19 = vadd.f32 %v1111_v22, %v451_v17  ;;  %v472_v20 = vadd.f32 %v1111_v22, %v471_v18 }
  0xcc   : > { %v539_v21 = vmax.f32 %v490_v15, 0.0  ;;  %v547_v23 = vmax.f32 %v510_v16, 0.0 }
  0xcd   : > { %v524_v24 = vmax.f32 %v452_v19, 0.0  ;;  %v532_v25 = vmax.f32 %v472_v20, 0.0 }
  0xce   : > { %571 = vst [vmem:[%s1117_s21 + $0xa0] sm:$0xff] %v539_v21 }
  0xcf   : > { %579 = vst [vmem:[%s1117_s21 + $0xe0] sm:$0xff] %v547_v23 }
  0xd0   : > { %556 = vst [vmem:[%s1117_s21 + $0x28] sm:$0xff] %v524_v24 }
  0xd1   : > { %564 = vst [vmem:[%s1117_s21 + $0x68] sm:$0xff] %v532_v25  ;;  %v491_v26 = vpop.f32.mrf.mxu2  ;;  %v511_v27 = vpop.f32.mrf.mxu3 }
  0xd2   : > { %v492_v28 = vadd.f32 %v1111_v22, %v491_v26  ;;  %v512_v29 = vadd.f32 %v1111_v22, %v511_v27  ;;  %v454_v30 = vpop.f32.mrf.mxu0  ;;  %v474_v31 = vpop.f32.mrf.mxu1 }
  0xd3   : > { %v455_v32 = vadd.f32 %v1111_v22, %v454_v30  ;;  %v475_v33 = vadd.f32 %v1111_v22, %v474_v31 }
  0xd4   : > { %v540_v34 = vmax.f32 %v492_v28, 0.0  ;;  %v548_v35 = vmax.f32 %v512_v29, 0.0 }
  0xd5   : > { %v525_v36 = vmax.f32 %v455_v32, 0.0  ;;  %v533_v37 = vmax.f32 %v475_v33, 0.0 }
  0xd6   : > { %572 = vst [vmem:[%s1117_s21 + $0xa8] sm:$0xff] %v540_v34 }
  0xd7   : > { %580 = vst [vmem:[%s1117_s21 + $0xe8] sm:$0xff] %v548_v35 }
  0xd8   : > { %557 = vst [vmem:[%s1117_s21 + $0x30] sm:$0xff] %v525_v36 }
  0xd9   : > { %565 = vst [vmem:[%s1117_s21 + $0x70] sm:$0xff] %v533_v37  ;;  %v494_v38 = vpop.f32.mrf.mxu2  ;;  %v514_v39 = vpop.f32.mrf.mxu3 }
  0xda   : > { %v495_v40 = vadd.f32 %v1111_v22, %v494_v38  ;;  %v515_v41 = vadd.f32 %v1111_v22, %v514_v39  ;;  %v456_v42 = vpop.f32.mrf.mxu0  ;;  %v476_v43 = vpop.f32.mrf.mxu1 }
  0xdb   : > { %v457_v44 = vadd.f32 %v1111_v22, %v456_v42  ;;  %v477_v45 = vadd.f32 %v1111_v22, %v476_v43 }
  0xdc   : > { %v541_v46 = vmax.f32 %v495_v40, 0.0  ;;  %v549_v47 = vmax.f32 %v515_v41, 0.0 }
  0xdd   : > { %v526_v48 = vmax.f32 %v457_v44, 0.0  ;;  %v534_v49 = vmax.f32 %v477_v45, 0.0 }
  0xde   : > { %573 = vst [vmem:[%s1117_s21 + $0xb0] sm:$0xff] %v541_v46 }
  0xdf   : > { %581 = vst [vmem:[%s1117_s21 + $0xf0] sm:$0xff] %v549_v47 }
  0xe0   : > { %558 = vst [vmem:[%s1117_s21 + $0x38] sm:$0xff] %v526_v48 }
  0xe1   : > { %566 = vst [vmem:[%s1117_s21 + $0x78] sm:$0xff] %v534_v49  ;;  %v496_v50 = vpop.f32.mrf.mxu2  ;;  %v516_v51 = vpop.f32.mrf.mxu3 }
  0xe2   : > { %v497_v52 = vadd.f32 %v1111_v22, %v496_v50  ;;  %v517_v53 = vadd.f32 %v1111_v22, %v516_v51 }
  0xe4   : > { %v542_v54 = vmax.f32 %v497_v52, 0.0  ;;  %v550_v55 = vmax.f32 %v517_v53, 0.0 }
  0xe6   : > { %574 = vst [vmem:[%s1117_s21 + $0xb8] sm:$0xff] %v542_v54 }
  0xe7   : > { %582 = vst [vmem:[%s1117_s21 + $0xf8] sm:$0xff] %v550_v55 }
  0xe8   : > { %929 = shalt.err (!%p926_p5)
}
  0xe9   : > { %s982_s10 = smov 128   ;;  %s983_s18 = smov 8  }
  0xea   : > { %844 = dma.vmem_to_hbm [thread:$0]  (%p1044_p4), %s600_s29, 4096, %s602_s15, %s584_s30, %s982_s10, %s982_s10, %s983_s18  }
  0xeb PF: > { %p850_p6 = scmp.ge.s32.totalorder %s980_s17, 2  ;;  %s616_s19 = sand.u32 1, %s960_s12  }
  0xec   : > { %s617_s21 = scalar_lea.sflag [#allocation3], %s616_s19 }
  0xed   : > { %p847_p7 = pnand %p850_p6, %p1051_p8 }
  0xef   : > { %p848_p9 = pneg %p847_p7 }
  0xf1   : > { %955 = dma.done.wait (%p848_p9), %s617_s21, 4096  }
  0xf2   : > { %957 = vsyncadd (%p848_p9), %s617_s21, 4294963200  ;;  %s16_s17 = sadd.s32 1, %s980_s17   ;;  %s1226_s12 = smov %s964_s13 }
  0xf3   : > { %p13_p10 = scmp.ge.s32.totalorder %s16_s17, 4   ;;  %s1227_s13 = smov %s968_s14 }
  0xf4   : > { %s1228_s14 = smov %s1057_s25  ;;  %s1229_s15 = smov %s976_s16 }
  0xf5   : > { %s1230_s16 = smov %s1232_s20  ;;  %15 = sbr.rel (!%p13_p10) target bundleno = 4 (0x4), region = 73 }
  0xfa   :  { %623 = vsyncpa [#allocation3], 1 }
  0xfb   :  { %625 = vsyncpa [#allocation3 + $0x1], 1 }

</bundles_post_ra>
